<compile_context>
chip_gen: v5e
topology: v5e:2x2
jax: 0.10.0
libtpu: 0.0.40
codegen_flags: <defaults>
</compile_context>

<pallas_src>
import functools
import math

import jax
import jax.numpy as jnp
from jax import lax
from jax.experimental import pallas as pl
from jax.experimental.pallas import tpu as pltpu

_LOG_EPS = 1e-8        # matches the `+ 1e-8` inside the reference Sinkhorn log()
_CHECK_EVERY = 5       # Sinkhorn iterations between convergence checks


def _lse(m, axis):
    """Numerically stable logsumexp with keepdims=True."""
    mx = jnp.max(m, axis=axis, keepdims=True)
    return mx + jnp.log(jnp.sum(jnp.exp(m - mx), axis=axis, keepdims=True))


def opta_kernel(zs_ref, zq_ref, out_ref, *, inv_eps, max_iter, thresh_scaled):
    xs = zs_ref[...].astype(jnp.float32)   # (Bt, Ns, D) support prototypes
    xq = zq_ref[...].astype(jnp.float32)   # (Bt, Nq, D) query features
    bt, ns, _ = xs.shape
    nq = xq.shape[1]

    # Squared-Euclidean cost per packed episode via the Gram expansion.
    xs_sq = jnp.sum(xs * xs, axis=-1, keepdims=True)          # (Bt, Ns, 1)
    xq_sq = jnp.sum(xq * xq, axis=-1)[:, None, :]             # (Bt, 1, Nq)
    # HIGHEST kept on purpose: errors here get multiplied by 1/eps inside
    # exp(); this matmul runs once per grid step, outside the Sinkhorn loop.
    gram = jnp.einsum("bid,bjd->bij", xs, xq,
                      preferred_element_type=jnp.float32,
                      precision=lax.Precision.HIGHEST)        # (Bt, Ns, Nq)
    C = jnp.maximum(xs_sq + xq_sq - 2.0 * gram, 0.0)

    # K = -C / eps precomputed once; duals carried in scaled form (u/eps, v/eps).
    K = -C * inv_eps                                          # (Bt, Ns, Nq)

    log_mu = jnp.float32(math.log(1.0 / ns + _LOG_EPS))       # uniform marginals
    log_nu = jnp.float32(math.log(1.0 / nq + _LOG_EPS))

    chunk = max(1, min(_CHECK_EVERY, max_iter))
    n_chunks = -(-max_iter // chunk) if max_iter > 0 else 0

    def one_iter(_, carry):
        ut, vt, _ = carry
        Kv = K + vt                                           # reused for u & v updates
        delta = log_mu - _lse(Kv + ut, axis=-1)               # (Bt, Ns, 1)
        ut_new = ut + delta
        vt_new = vt + (log_nu - _lse(Kv + ut_new, axis=1))    # (Bt, 1, Nq)
        return ut_new, vt_new, delta

    def cond(carry):
        c, _, _, err = carry
        return jnp.logical_and(c < n_chunks, err >= thresh_scaled)

    def body(carry):
        c, ut, vt, _ = carry
        # Fully unrolled chunk of Sinkhorn updates (LLO scheduler visibility);
        # no convergence bookkeeping inside.
        ut, vt, delta = lax.fori_loop(
            0, chunk, one_iter, (ut, vt, jnp.zeros_like(ut)), unroll=True)
        # Convergence metric once per chunk, reusing the last delta:
        # max over packed episodes of sum|u_new - u| (in 1/eps-scaled units).
        err = jnp.max(jnp.sum(jnp.abs(delta), axis=1, keepdims=True))
        return c + 1, ut, vt, err

    ut0 = jnp.zeros((bt, ns, 1), jnp.float32)
    vt0 = jnp.zeros((bt, 1, nq), jnp.float32)
    _, ut, vt, _ = lax.while_loop(
        cond, body, (jnp.int32(0), ut0, vt0, jnp.float32(jnp.inf)))

    pi = jnp.exp(K + ut + vt)                                 # transport plan (Bt, Ns, Nq)
    row_sum = jnp.sum(pi, axis=-1, keepdims=True)             # (Bt, Ns, 1)
    plan = pi / row_sum                                       # exact row normalization
    # Barycentric mapping of support prototypes onto query features.
    out = jnp.einsum("bij,bjd->bid", plan, xq,
                     preferred_element_type=jnp.float32)      # DEFAULT precision
    out_ref[...] = out.astype(out_ref.dtype)


def _episodes_per_step(B, Nq):
    """Episodes packed per grid step: fill ~128 lanes, keep >=2 steps for v7x."""
    target = max(1, 128 // max(1, Nq))
    bt = max(1, min(target, B))
    if B > 1 and -(-B // bt) < 2:      # would leave one TensorCore idle on v7x
        bt = -(-B // 2)
    return bt


def opta(z_support, z_query, *, regularization, max_iter, stopping_criterion):
    """Pallas OpTA.forward: returns (transported_support, unchanged_query).

    Accepts unbatched (Ns, D)/(Nq, D) like the reference module, or batched
    (B, Ns, D)/(B, Nq, D) episodes (Bt episodes packed per grid step).
    """
    squeeze = z_support.ndim == 2
    zs = z_support[None] if squeeze else z_support            # (B, Ns, D)
    zq = z_query[None] if squeeze else z_query                # (B, Nq, D)
    B, Ns, D = zs.shape
    Bq, Nq, Dq = zq.shape
    assert B == Bq and D == Dq, "support/query batch + feature dims must match"

    Bt = _episodes_per_step(B, Nq)
    G = -(-B // Bt)
    Bpad = G * Bt
    if Bpad != B:  # pad with zero episodes (converge instantly, sliced off below)
        zs = jnp.concatenate([zs, jnp.zeros((Bpad - B, Ns, D), zs.dtype)], axis=0)
        zq = jnp.concatenate([zq, jnp.zeros((Bpad - B, Nq, D), zq.dtype)], axis=0)

    eps = float(regularization)
    kernel = functools.partial(
        opta_kernel,
        inv_eps=1.0 / eps,
        max_iter=int(max_iter),
        thresh_scaled=float(stopping_criterion) / eps,
    )
    out = pl.pallas_call(
        kernel,
        out_shape=jax.ShapeDtypeStruct((Bpad, Ns, D), zs.dtype),
        grid=(G,),
        in_specs=[
            pl.BlockSpec((Bt, Ns, D), lambda g: (g, 0, 0)),
            pl.BlockSpec((Bt, Nq, D), lambda g: (g, 0, 0)),
        ],
        out_specs=pl.BlockSpec((Bt, Ns, D), lambda g: (g, 0, 0)),
        compiler_params=pltpu.CompilerParams(
            dimension_semantics=("parallel",)),
    )(zs, zq)   # native dtype in; f32 upcast happens on the VMEM tile in-kernel

    out = out[:B]
    if squeeze:
        out = out[0]
    return out, z_query


if __name__ == "__main__":
    key = jax.random.PRNGKey(0)
    k1, k2, k3, k4 = jax.random.split(key, 4)

    # Few-shot-sized episode: Ns support prototypes, Nq queries, hidden dim D.
    Ns, Nq, D = 8, 16, 32
    z_support = jax.random.normal(k1, (Ns, D), dtype=jnp.float32)
    z_query = jax.random.normal(k2, (Nq, D), dtype=jnp.float32)

    zs_t, zq = opta(
        z_support, z_query,
        regularization=0.05,       # Sinkhorn eps
        max_iter=100,              # Sinkhorn max iterations
        stopping_criterion=1e-3,   # early-stop threshold on sum|u - u_prev|
    )
    jax.block_until_ready((zs_t, zq))
    assert zs_t.shape == (Ns, D) and zq.shape == (Nq, D)
    assert bool(jnp.all(jnp.isfinite(zs_t)))

    # Batched episodes: Bt episodes packed per grid step (>=2 balanced grid
    # steps so both v7x TensorCores get work; single TC on v5e/v6e).
    B = 4
    zs_b = jax.random.normal(k3, (B, Ns, D), dtype=jnp.float32)
    zq_b = jax.random.normal(k4, (B, Nq, D), dtype=jnp.float32)
    zs_bt, _ = opta(
        zs_b, zq_b,
        regularization=0.05, max_iter=100, stopping_criterion=1e-3,
    )
    jax.block_until_ready(zs_bt)
    assert zs_bt.shape == (B, Ns, D)
    assert bool(jnp.all(jnp.isfinite(zs_bt)))

    print("KERNEL_OK")
</pallas_src>

<mosaic_0001>
module attributes {stable_mosaic.version = 11 : i64} {
  func.func @opta_kernel(%arg0: i32, %arg1: memref<1x8x32xf32, #tpu.memory_space<vmem>>, %arg2: memref<1x16x32xf32, #tpu.memory_space<vmem>>, %arg3: memref<1x8x32xf32, #tpu.memory_space<vmem>>) attributes {dimension_semantics = [#tpu.dimension_semantics<parallel>], iteration_bounds = array<i64: 1>, scalar_prefetch = 0 : i64, scratch_operands = 0 : i64, tpu.core_type = #tpu.core_type<tc>, window_params = [{transform_indices = @transform_0, window_bounds = array<i64: 1, 8, 32>}, {transform_indices = @transform_1, window_bounds = array<i64: 1, 16, 32>}, {transform_indices = @transform_2, window_bounds = array<i64: 1, 8, 32>}]} {
    %c0 = arith.constant 0 : index
    %c0_0 = arith.constant 0 : index
    %c0_1 = arith.constant 0 : index
    %0 = vector.load %arg1[%c0, %c0_0, %c0_1] : memref<1x8x32xf32, #tpu.memory_space<vmem>>, vector<1x8x32xf32>
    %c0_2 = arith.constant 0 : index
    %c0_3 = arith.constant 0 : index
    %c0_4 = arith.constant 0 : index
    %1 = vector.load %arg2[%c0_2, %c0_3, %c0_4] : memref<1x16x32xf32, #tpu.memory_space<vmem>>, vector<1x16x32xf32>
    %2 = arith.mulf %0, %0 : vector<1x8x32xf32>
    %cst = arith.constant dense<0.000000e+00> : vector<1x8xf32>
    %3 = vector.multi_reduction <add>, %2, %cst [2] : vector<1x8x32xf32> to vector<1x8xf32>
    %4 = vector.shape_cast %3 : vector<1x8xf32> to vector<1x8x1xf32>
    %5 = arith.mulf %1, %1 : vector<1x16x32xf32>
    %cst_5 = arith.constant dense<0.000000e+00> : vector<1x16xf32>
    %6 = vector.multi_reduction <add>, %5, %cst_5 [2] : vector<1x16x32xf32> to vector<1x16xf32>
    %7 = vector.shape_cast %6 : vector<1x16xf32> to vector<1x1x16xf32>
    "tpu.trace_start"() <{level = 10 : i32, message = "bid,bjd->bij"}> : () -> ()
    %cst_6 = arith.constant dense<0.000000e+00> : vector<1x8x16xf32>
    %8 = tpu.matmul %0, %1, %cst_6 {dimension_numbers = #tpu.dot_dimension_numbers<[2], [2], [1], [1], [0, 0, 0, 1, 1, 1], [0], [0]>, precision = #tpu.contract_precision<fp32>} : vector<1x8x32xf32>, vector<1x16x32xf32>, vector<1x8x16xf32> -> vector<1x8x16xf32>
    "tpu.trace_stop"() : () -> ()
    %9 = vector.broadcast %4 : vector<1x8x1xf32> to vector<1x8x16xf32>
    %10 = vector.broadcast %7 : vector<1x1x16xf32> to vector<1x8x16xf32>
    %11 = arith.addf %9, %10 : vector<1x8x16xf32>
    %cst_7 = arith.constant 2.000000e+00 : f32
    %12 = vector.broadcast %cst_7 : f32 to vector<1x8x16xf32>
    %13 = arith.mulf %12, %8 : vector<1x8x16xf32>
    %14 = arith.subf %11, %13 : vector<1x8x16xf32>
    %cst_8 = arith.constant 0.000000e+00 : f32
    %15 = vector.broadcast %cst_8 : f32 to vector<1x8x16xf32>
    %16 = arith.maximumf %14, %15 : vector<1x8x16xf32>
    %cst_9 = arith.constant 0.000000e+00 : f32
    %17 = vector.broadcast %cst_9 : f32 to vector<1x8x16xf32>
    %18 = arith.subf %17, %16 : vector<1x8x16xf32>
    %cst_10 = arith.constant 2.000000e+01 : f32
    %19 = vector.broadcast %cst_10 : f32 to vector<1x8x16xf32>
    %20 = arith.mulf %18, %19 : vector<1x8x16xf32>
    %cst_11 = arith.constant 0.000000e+00 : f32
    %21 = vector.broadcast %cst_11 : f32 to vector<1x8x1xf32>
    %cst_12 = arith.constant 0.000000e+00 : f32
    %22 = vector.broadcast %cst_12 : f32 to vector<1x1x16xf32>
    %cst_13 = arith.constant -2.07944155 : f32
    %cst_14 = arith.constant -2.77258849 : f32
    %c0_i32 = arith.constant 0 : i32
    %cst_15 = arith.constant 0x7F800000 : f32
    %23:4 = scf.while (%arg4 = %c0_i32, %arg5 = %21, %arg6 = %22, %arg7 = %cst_15) : (i32, vector<1x8x1xf32>, vector<1x1x16xf32>, f32) -> (i32, vector<1x8x1xf32>, vector<1x1x16xf32>, f32) {
      %c20_i32 = arith.constant 20 : i32
      %35 = arith.cmpi slt, %arg4, %c20_i32 : i32
      %cst_21 = arith.constant 2.000000e-02 : f32
      %36 = arith.cmpf oge, %arg7, %cst_21 : f32
      %37 = arith.andi %35, %36 : i1
      scf.condition(%37) %arg4, %arg5, %arg6, %arg7 : i32, vector<1x8x1xf32>, vector<1x1x16xf32>, f32
    } do {
    ^bb0(%arg4: i32, %arg5: vector<1x8x1xf32>, %arg6: vector<1x1x16xf32>, %arg7: f32):
      %cst_21 = arith.constant 0.000000e+00 : f32
      %35 = vector.broadcast %cst_21 : f32 to vector<1x8x1xf32>
      %c0_i32_22 = arith.constant 0 : i32
      %36 = vector.broadcast %arg6 : vector<1x1x16xf32> to vector<1x8x16xf32>
      %37 = arith.addf %20, %36 : vector<1x8x16xf32>
      %38 = vector.broadcast %arg5 : vector<1x8x1xf32> to vector<1x8x16xf32>
      %39 = arith.addf %37, %38 : vector<1x8x16xf32>
      %cst_23 = arith.constant dense<0xFF800000> : vector<1x8xf32>
      %40 = vector.multi_reduction <maximumf>, %39, %cst_23 [2] : vector<1x8x16xf32> to vector<1x8xf32>
      %41 = vector.shape_cast %40 : vector<1x8xf32> to vector<1x8x1xf32>
      %42 = vector.broadcast %41 : vector<1x8x1xf32> to vector<1x8x16xf32>
      %43 = arith.subf %39, %42 : vector<1x8x16xf32>
      %44 = math.exp %43 : vector<1x8x16xf32>
      %cst_24 = arith.constant dense<0.000000e+00> : vector<1x8xf32>
      %45 = vector.multi_reduction <add>, %44, %cst_24 [2] : vector<1x8x16xf32> to vector<1x8xf32>
      %46 = vector.shape_cast %45 : vector<1x8xf32> to vector<1x8x1xf32>
      %47 = math.log %46 : vector<1x8x1xf32>
      %48 = arith.addf %41, %47 : vector<1x8x1xf32>
      %49 = vector.broadcast %cst_13 : f32 to vector<1x8x1xf32>
      %50 = arith.subf %49, %48 : vector<1x8x1xf32>
      %51 = arith.addf %arg5, %50 : vector<1x8x1xf32>
      %52 = vector.broadcast %51 : vector<1x8x1xf32> to vector<1x8x16xf32>
      %53 = arith.addf %37, %52 : vector<1x8x16xf32>
      %cst_25 = arith.constant dense<0xFF800000> : vector<1x16xf32>
      %54 = vector.multi_reduction <maximumf>, %53, %cst_25 [1] : vector<1x8x16xf32> to vector<1x16xf32>
      %55 = vector.shape_cast %54 : vector<1x16xf32> to vector<1x1x16xf32>
      %56 = vector.broadcast %55 : vector<1x1x16xf32> to vector<1x8x16xf32>
      %57 = arith.subf %53, %56 : vector<1x8x16xf32>
      %58 = math.exp %57 : vector<1x8x16xf32>
      %cst_26 = arith.constant dense<0.000000e+00> : vector<1x16xf32>
      %59 = vector.multi_reduction <add>, %58, %cst_26 [1] : vector<1x8x16xf32> to vector<1x16xf32>
      %60 = vector.shape_cast %59 : vector<1x16xf32> to vector<1x1x16xf32>
      %61 = math.log %60 : vector<1x1x16xf32>
      %62 = arith.addf %55, %61 : vector<1x1x16xf32>
      %63 = vector.broadcast %cst_14 : f32 to vector<1x1x16xf32>
      %64 = arith.subf %63, %62 : vector<1x1x16xf32>
      %65 = arith.addf %arg6, %64 : vector<1x1x16xf32>
      %c1_i32 = arith.constant 1 : i32
      %66 = vector.broadcast %65 : vector<1x1x16xf32> to vector<1x8x16xf32>
      %67 = arith.addf %20, %66 : vector<1x8x16xf32>
      %68 = vector.broadcast %51 : vector<1x8x1xf32> to vector<1x8x16xf32>
      %69 = arith.addf %67, %68 : vector<1x8x16xf32>
      %cst_27 = arith.constant dense<0xFF800000> : vector<1x8xf32>
      %70 = vector.multi_reduction <maximumf>, %69, %cst_27 [2] : vector<1x8x16xf32> to vector<1x8xf32>
      %71 = vector.shape_cast %70 : vector<1x8xf32> to vector<1x8x1xf32>
      %72 = vector.broadcast %71 : vector<1x8x1xf32> to vector<1x8x16xf32>
      %73 = arith.subf %69, %72 : vector<1x8x16xf32>
      %74 = math.exp %73 : vector<1x8x16xf32>
      %cst_28 = arith.constant dense<0.000000e+00> : vector<1x8xf32>
      %75 = vector.multi_reduction <add>, %74, %cst_28 [2] : vector<1x8x16xf32> to vector<1x8xf32>
      %76 = vector.shape_cast %75 : vector<1x8xf32> to vector<1x8x1xf32>
      %77 = math.log %76 : vector<1x8x1xf32>
      %78 = arith.addf %71, %77 : vector<1x8x1xf32>
      %79 = vector.broadcast %cst_13 : f32 to vector<1x8x1xf32>
      %80 = arith.subf %79, %78 : vector<1x8x1xf32>
      %81 = arith.addf %51, %80 : vector<1x8x1xf32>
      %82 = vector.broadcast %81 : vector<1x8x1xf32> to vector<1x8x16xf32>
      %83 = arith.addf %67, %82 : vector<1x8x16xf32>
      %cst_29 = arith.constant dense<0xFF800000> : vector<1x16xf32>
      %84 = vector.multi_reduction <maximumf>, %83, %cst_29 [1] : vector<1x8x16xf32> to vector<1x16xf32>
      %85 = vector.shape_cast %84 : vector<1x16xf32> to vector<1x1x16xf32>
      %86 = vector.broadcast %85 : vector<1x1x16xf32> to vector<1x8x16xf32>
      %87 = arith.subf %83, %86 : vector<1x8x16xf32>
      %88 = math.exp %87 : vector<1x8x16xf32>
      %cst_30 = arith.constant dense<0.000000e+00> : vector<1x16xf32>
      %89 = vector.multi_reduction <add>, %88, %cst_30 [1] : vector<1x8x16xf32> to vector<1x16xf32>
      %90 = vector.shape_cast %89 : vector<1x16xf32> to vector<1x1x16xf32>
      %91 = math.log %90 : vector<1x1x16xf32>
      %92 = arith.addf %85, %91 : vector<1x1x16xf32>
      %93 = vector.broadcast %cst_14 : f32 to vector<1x1x16xf32>
      %94 = arith.subf %93, %92 : vector<1x1x16xf32>
      %95 = arith.addf %65, %94 : vector<1x1x16xf32>
      %c2_i32 = arith.constant 2 : i32
      %96 = vector.broadcast %95 : vector<1x1x16xf32> to vector<1x8x16xf32>
      %97 = arith.addf %20, %96 : vector<1x8x16xf32>
      %98 = vector.broadcast %81 : vector<1x8x1xf32> to vector<1x8x16xf32>
      %99 = arith.addf %97, %98 : vector<1x8x16xf32>
      %cst_31 = arith.constant dense<0xFF800000> : vector<1x8xf32>
      %100 = vector.multi_reduction <maximumf>, %99, %cst_31 [2] : vector<1x8x16xf32> to vector<1x8xf32>
      %101 = vector.shape_cast %100 : vector<1x8xf32> to vector<1x8x1xf32>
      %102 = vector.broadcast %101 : vector<1x8x1xf32> to vector<1x8x16xf32>
      %103 = arith.subf %99, %102 : vector<1x8x16xf32>
      %104 = math.exp %103 : vector<1x8x16xf32>
      %cst_32 = arith.constant dense<0.000000e+00> : vector<1x8xf32>
      %105 = vector.multi_reduction <add>, %104, %cst_32 [2] : vector<1x8x16xf32> to vector<1x8xf32>
      %106 = vector.shape_cast %105 : vector<1x8xf32> to vector<1x8x1xf32>
      %107 = math.log %106 : vector<1x8x1xf32>
      %108 = arith.addf %101, %107 : vector<1x8x1xf32>
      %109 = vector.broadcast %cst_13 : f32 to vector<1x8x1xf32>
      %110 = arith.subf %109, %108 : vector<1x8x1xf32>
      %111 = arith.addf %81, %110 : vector<1x8x1xf32>
      %112 = vector.broadcast %111 : vector<1x8x1xf32> to vector<1x8x16xf32>
      %113 = arith.addf %97, %112 : vector<1x8x16xf32>
      %cst_33 = arith.constant dense<0xFF800000> : vector<1x16xf32>
      %114 = vector.multi_reduction <maximumf>, %113, %cst_33 [1] : vector<1x8x16xf32> to vector<1x16xf32>
      %115 = vector.shape_cast %114 : vector<1x16xf32> to vector<1x1x16xf32>
      %116 = vector.broadcast %115 : vector<1x1x16xf32> to vector<1x8x16xf32>
      %117 = arith.subf %113, %116 : vector<1x8x16xf32>
      %118 = math.exp %117 : vector<1x8x16xf32>
      %cst_34 = arith.constant dense<0.000000e+00> : vector<1x16xf32>
      %119 = vector.multi_reduction <add>, %118, %cst_34 [1] : vector<1x8x16xf32> to vector<1x16xf32>
      %120 = vector.shape_cast %119 : vector<1x16xf32> to vector<1x1x16xf32>
      %121 = math.log %120 : vector<1x1x16xf32>
      %122 = arith.addf %115, %121 : vector<1x1x16xf32>
      %123 = vector.broadcast %cst_14 : f32 to vector<1x1x16xf32>
      %124 = arith.subf %123, %122 : vector<1x1x16xf32>
      %125 = arith.addf %95, %124 : vector<1x1x16xf32>
      %c3_i32 = arith.constant 3 : i32
      %126 = vector.broadcast %125 : vector<1x1x16xf32> to vector<1x8x16xf32>
      %127 = arith.addf %20, %126 : vector<1x8x16xf32>
      %128 = vector.broadcast %111 : vector<1x8x1xf32> to vector<1x8x16xf32>
      %129 = arith.addf %127, %128 : vector<1x8x16xf32>
      %cst_35 = arith.constant dense<0xFF800000> : vector<1x8xf32>
      %130 = vector.multi_reduction <maximumf>, %129, %cst_35 [2] : vector<1x8x16xf32> to vector<1x8xf32>
      %131 = vector.shape_cast %130 : vector<1x8xf32> to vector<1x8x1xf32>
      %132 = vector.broadcast %131 : vector<1x8x1xf32> to vector<1x8x16xf32>
      %133 = arith.subf %129, %132 : vector<1x8x16xf32>
      %134 = math.exp %133 : vector<1x8x16xf32>
      %cst_36 = arith.constant dense<0.000000e+00> : vector<1x8xf32>
      %135 = vector.multi_reduction <add>, %134, %cst_36 [2] : vector<1x8x16xf32> to vector<1x8xf32>
      %136 = vector.shape_cast %135 : vector<1x8xf32> to vector<1x8x1xf32>
      %137 = math.log %136 : vector<1x8x1xf32>
      %138 = arith.addf %131, %137 : vector<1x8x1xf32>
      %139 = vector.broadcast %cst_13 : f32 to vector<1x8x1xf32>
      %140 = arith.subf %139, %138 : vector<1x8x1xf32>
      %141 = arith.addf %111, %140 : vector<1x8x1xf32>
      %142 = vector.broadcast %141 : vector<1x8x1xf32> to vector<1x8x16xf32>
      %143 = arith.addf %127, %142 : vector<1x8x16xf32>
      %cst_37 = arith.constant dense<0xFF800000> : vector<1x16xf32>
      %144 = vector.multi_reduction <maximumf>, %143, %cst_37 [1] : vector<1x8x16xf32> to vector<1x16xf32>
      %145 = vector.shape_cast %144 : vector<1x16xf32> to vector<1x1x16xf32>
      %146 = vector.broadcast %145 : vector<1x1x16xf32> to vector<1x8x16xf32>
      %147 = arith.subf %143, %146 : vector<1x8x16xf32>
      %148 = math.exp %147 : vector<1x8x16xf32>
      %cst_38 = arith.constant dense<0.000000e+00> : vector<1x16xf32>
      %149 = vector.multi_reduction <add>, %148, %cst_38 [1] : vector<1x8x16xf32> to vector<1x16xf32>
      %150 = vector.shape_cast %149 : vector<1x16xf32> to vector<1x1x16xf32>
      %151 = math.log %150 : vector<1x1x16xf32>
      %152 = arith.addf %145, %151 : vector<1x1x16xf32>
      %153 = vector.broadcast %cst_14 : f32 to vector<1x1x16xf32>
      %154 = arith.subf %153, %152 : vector<1x1x16xf32>
      %155 = arith.addf %125, %154 : vector<1x1x16xf32>
      %c4_i32 = arith.constant 4 : i32
      %156 = vector.broadcast %155 : vector<1x1x16xf32> to vector<1x8x16xf32>
      %157 = arith.addf %20, %156 : vector<1x8x16xf32>
      %158 = vector.broadcast %141 : vector<1x8x1xf32> to vector<1x8x16xf32>
      %159 = arith.addf %157, %158 : vector<1x8x16xf32>
      %cst_39 = arith.constant dense<0xFF800000> : vector<1x8xf32>
      %160 = vector.multi_reduction <maximumf>, %159, %cst_39 [2] : vector<1x8x16xf32> to vector<1x8xf32>
      %161 = vector.shape_cast %160 : vector<1x8xf32> to vector<1x8x1xf32>
      %162 = vector.broadcast %161 : vector<1x8x1xf32> to vector<1x8x16xf32>
      %163 = arith.subf %159, %162 : vector<1x8x16xf32>
      %164 = math.exp %163 : vector<1x8x16xf32>
      %cst_40 = arith.constant dense<0.000000e+00> : vector<1x8xf32>
      %165 = vector.multi_reduction <add>, %164, %cst_40 [2] : vector<1x8x16xf32> to vector<1x8xf32>
      %166 = vector.shape_cast %165 : vector<1x8xf32> to vector<1x8x1xf32>
      %167 = math.log %166 : vector<1x8x1xf32>
      %168 = arith.addf %161, %167 : vector<1x8x1xf32>
      %169 = vector.broadcast %cst_13 : f32 to vector<1x8x1xf32>
      %170 = arith.subf %169, %168 : vector<1x8x1xf32>
      %171 = arith.addf %141, %170 : vector<1x8x1xf32>
      %172 = vector.broadcast %171 : vector<1x8x1xf32> to vector<1x8x16xf32>
      %173 = arith.addf %157, %172 : vector<1x8x16xf32>
      %cst_41 = arith.constant dense<0xFF800000> : vector<1x16xf32>
      %174 = vector.multi_reduction <maximumf>, %173, %cst_41 [1] : vector<1x8x16xf32> to vector<1x16xf32>
      %175 = vector.shape_cast %174 : vector<1x16xf32> to vector<1x1x16xf32>
      %176 = vector.broadcast %175 : vector<1x1x16xf32> to vector<1x8x16xf32>
      %177 = arith.subf %173, %176 : vector<1x8x16xf32>
      %178 = math.exp %177 : vector<1x8x16xf32>
      %cst_42 = arith.constant dense<0.000000e+00> : vector<1x16xf32>
      %179 = vector.multi_reduction <add>, %178, %cst_42 [1] : vector<1x8x16xf32> to vector<1x16xf32>
      %180 = vector.shape_cast %179 : vector<1x16xf32> to vector<1x1x16xf32>
      %181 = math.log %180 : vector<1x1x16xf32>
      %182 = arith.addf %175, %181 : vector<1x1x16xf32>
      %183 = vector.broadcast %cst_14 : f32 to vector<1x1x16xf32>
      %184 = arith.subf %183, %182 : vector<1x1x16xf32>
      %185 = arith.addf %155, %184 : vector<1x1x16xf32>
      %c5_i32 = arith.constant 5 : i32
      %186 = math.absf %170 : vector<1x8x1xf32>
      %cst_43 = arith.constant dense<0.000000e+00> : vector<1x1xf32>
      %187 = vector.multi_reduction <add>, %186, %cst_43 [1] : vector<1x8x1xf32> to vector<1x1xf32>
      %188 = vector.shape_cast %187 : vector<1x1xf32> to vector<1x1x1xf32>
      %189 = vector.shape_cast %188 : vector<1x1x1xf32> to vector<1x1x1x1xf32>
      %cst_44 = arith.constant dense<0xFF800000> : vector<1xf32>
      %190 = vector.multi_reduction <maximumf>, %189, %cst_44 [1, 2, 3] : vector<1x1x1x1xf32> to vector<1xf32>
      %191 = vector.shape_cast %190 : vector<1xf32> to vector<1x1x1x1xf32>
      %192 = vector.extract %191[0, 0, 0, 0] : f32 from vector<1x1x1x1xf32>
      %c1_i32_45 = arith.constant 1 : i32
      %193 = arith.addi %arg4, %c1_i32_45 : i32
      scf.yield %193, %171, %185, %192 : i32, vector<1x8x1xf32>, vector<1x1x16xf32>, f32
    }
    %24 = vector.broadcast %23#1 : vector<1x8x1xf32> to vector<1x8x16xf32>
    %25 = arith.addf %20, %24 : vector<1x8x16xf32>
    %26 = vector.broadcast %23#2 : vector<1x1x16xf32> to vector<1x8x16xf32>
    %27 = arith.addf %25, %26 : vector<1x8x16xf32>
    %28 = math.exp %27 : vector<1x8x16xf32>
    %cst_16 = arith.constant dense<0.000000e+00> : vector<1x8xf32>
    %29 = vector.multi_reduction <add>, %28, %cst_16 [2] : vector<1x8x16xf32> to vector<1x8xf32>
    %30 = vector.shape_cast %29 : vector<1x8xf32> to vector<1x8x1xf32>
    %31 = vector.broadcast %30 : vector<1x8x1xf32> to vector<1x8x16xf32>
    %32 = arith.divf %28, %31 : vector<1x8x16xf32>
    "tpu.trace_start"() <{level = 10 : i32, message = "bij,bjd->bid"}> : () -> ()
    %cst_17 = arith.constant dense<0.000000e+00> : vector<1x8x32xf32>
    %33 = tpu.matmul %32, %1, %cst_17 {dimension_numbers = #tpu.dot_dimension_numbers<[2], [1], [1], [2], [0, 0, 0, 1, 1, 2], [0], [0]>} : vector<1x8x16xf32>, vector<1x16x32xf32>, vector<1x8x32xf32> -> vector<1x8x32xf32>
    "tpu.trace_stop"() : () -> ()
    %c0_18 = arith.constant 0 : index
    %c0_19 = arith.constant 0 : index
    %c0_20 = arith.constant 0 : index
    %34 = vector.load %arg3[%c0_18, %c0_19, %c0_20] : memref<1x8x32xf32, #tpu.memory_space<vmem>>, vector<1x8x32xf32>
    tpu.vector_store %arg3[%c0_18, %c0_19, %c0_20], %33 {strides = array<i32>} : memref<1x8x32xf32, #tpu.memory_space<vmem>>, vector<1x8x32xf32>,
    return
  }
  func.func @transform_0(%arg0: i32) -> (i32, i32, i32) {
    %c0_i32 = arith.constant 0 : i32
    %c0_i32_0 = arith.constant 0 : i32
    %c0_i32_1 = arith.constant 0 : i32
    return %arg0, %c0_i32, %c0_i32_0 : i32, i32, i32
  }
  func.func @transform_1(%arg0: i32) -> (i32, i32, i32) {
    %c0_i32 = arith.constant 0 : i32
    %c0_i32_0 = arith.constant 0 : i32
    %c0_i32_1 = arith.constant 0 : i32
    return %arg0, %c0_i32, %c0_i32_0 : i32, i32, i32
  }
  func.func @transform_2(%arg0: i32) -> (i32, i32, i32) {
    %c0_i32 = arith.constant 0 : i32
    %c0_i32_0 = arith.constant 0 : i32
    %c0_i32_1 = arith.constant 0 : i32
    return %arg0, %c0_i32, %c0_i32_0 : i32, i32, i32
  }
}

</mosaic_0001>

<bundles_post_ra>
// kernel: tpu_custom_call.1
= control target key start
LH: loop header
LB: loop body
LE: loop exit
PB: predicated region body
PF: predicated region fallthrough
CT: control target
= control target key end

     0   :  { %7 = vsyncpa [#allocation3], 0  ;;  %s827_s0 = inlined_call_operand.hbm [shape: f32[1,8,32], index: 0, kind: input, shape index: {}]   ;;  %s828_s1 = inlined_call_operand.hbm [shape: f32[1,16,32], index: 1, kind: input, shape index: {}]   ;;  %s829_s2 = inlined_call_operand.hbm [shape: f32[1,8,32], index: 2, kind: output, shape index: {}]  }
   0x1   :  { %8 = vsyncpa [#allocation6], 0 }
   0x2   :  { %9 = vsyncpa [#allocation4], 0  ;;  %s15_s11 = sshll.u32 %s827_s0, 4  ;;  %s727_s12 = smov [#allocation2]   ;;  %s16_s11 = int_to_ptr.hbm [resolvable:$true] %s15_s11 }
   0x3   :  { %s17_s13 = sshll.u32 %s727_s12, 4  ;;  %s25_s16 = sshll.u32 %s828_s1, 4  ;;  %s18_s13 = int_to_ptr.vmem [resolvable:$true] %s17_s13  ;;  %s26_s16 = int_to_ptr.hbm [resolvable:$true] %s25_s16 }
   0x4   :  { %20 = dma.hbm_to_vmem [thread:$0]  %s16_s11, 128, %s18_s13, [#allocation3]  }
   0x5   :  { %s728_s17 = smov [#allocation5]   ;;  %s729_s19 = smov 128  }
   0x6   :  { %s27_s18 = sshll.u32 %s728_s17, 4  ;;  %s730_s20 = smov 8   ;;  %s28_s18 = int_to_ptr.vmem [resolvable:$true] %s27_s18 }
   0x7   :  { %33 = dma.hbm_to_vmem [thread:$0]  %s26_s16, 256, %s28_s18, [#allocation6], %s729_s19, %s729_s19, %s730_s20  }
   0x8   :  { %709 = dma.done.wait [#allocation3], 128  }
   0x9   :  { %710 = vsyncadd [#allocation3], 4294967168 }
   0xa   :  { %711 = dma.done.wait [#allocation6], 256  }
   0xb   :  { %712 = vsyncadd [#allocation6], 4294967040  ;;  %vm46_vm0 = vcmask 261120   ;;  %v753_v0 = vld [vmem:[#allocation5 + $0x8] sm:$0xff]  ;;  %v755_v1 = vld [vmem:[#allocation5] sm:$0xff]  ;;  %v228_v28 = vlaneseq  ;;  %vm233_vm1 = vcmask 130112  }
   0xc   :  { %v42_v2 = vld [vmem:[#allocation2] sm:$0xff]  ;;  %v65_v3 = vsel %vm46_vm0, %v753_v0, 0  ;;  %v62_v4 = vsel %vm46_vm0, %v755_v1, 0  ;;  %v50_v6 = vmul.f32 %v755_v1, %v755_v1  ;;  %v51_v19 = vmul.f32 %v753_v0, %v753_v0  ;;  %s775_s0 = smov 0  }
   0xd   :  { %v59_v5 = vsel %vm46_vm0, %v42_v2, 0  ;;  %v81_v7 = vand.u32 4294901760, %v65_v3  ;;  %v83_v8 = vand.u32 4294901760, %v62_v4  ;;  %v45_v11 = vmul.f32 %v42_v2, %v42_v2 }
   0xe   :  { %v85_v9 = vand.u32 4294901760, %v59_v5  ;;  %v52_v10 = vsel %vm46_vm0, %v50_v6, 0.0  ;;  %v55_v25 = vsel %vm46_vm0, %v51_v19, 0.0  ;;  %v229_v30 = vand.u32 127, %v228_v28 }
   0xf   :  { %v109_v12 = vsub.f32 %v65_v3, %v81_v7  ;;  %82 = vmatpush.xpose.msra.mxu0 %v81_v7  ;;  %166 = vmatpush.xpose.msra.mxu3 %v81_v7  ;;  %v115_v13 = vsub.f32 %v62_v4, %v83_v8  ;;  %v47_v15 = vsel %vm46_vm0, %v45_v11, 0.0  ;;  %v771_v53 = vmov 0.0  }
  0x10   :  { %v86_v14 = vsub.f32 %v59_v5, %v85_v9  ;;  %53 = vadd.xlane.f32.xlu0 %v52_v10  ;;  %48 = vadd.xlane.f32.xlu1 %v47_v15  ;;  %v231_v31 = vadd.s32 4294967288, %v229_v30  ;;  %v773_v54 = vmov 0.0  }
  0x11   :  { %141 = vmatpush.xpose.msra.mxu2 %v109_v12  ;;  %v110_v16 = vand.u32 4294901760, %v109_v12  ;;  %v116_v17 = vand.u32 4294901760, %v115_v13 }
  0x12   :  { %v87_v18 = vand.u32 4294901760, %v86_v14 }
  0x13   :  { %v111_v20 = vsub.f32 %v109_v12, %v110_v16  ;;  %84 = vmatpush.xpose.msra.mxu0 %v83_v8  ;;  %168 = vmatpush.xpose.msra.mxu3 %v83_v8  ;;  %v117_v21 = vsub.f32 %v115_v13, %v116_v17 }
  0x14   :  { %v88_v22 = vsub.f32 %v86_v14, %v87_v18 }
  0x15   :  { %v112_v23 = vand.u32 4294901760, %v111_v20  ;;  %144 = vmatpush.xpose.msra.mxu2 %v115_v13  ;;  %v118_v26 = vand.u32 4294901760, %v117_v21 }
  0x16   :  { %v89_v24 = vand.u32 4294901760, %v88_v22  ;;  %172 = vmatmul.f32.vlgmr.msra.gmra.mxu3 %v87_v18 }
  0x17   :  { %193 = vmatpush.xpose.msrb.mxu0 %v110_v16  ;;  %113 = vmatpush.xpose.msra.mxu1 %v112_v23 }
  0x18   :  { %90 = vmatmul.f32.vlgmr.msra.gmra.mxu0 %v89_v24  ;;  %147 = vmatmul.f32.vlgmr.msra.gmra.mxu2 %v86_v14 }
  0x19   :  { %56 = vadd.xlane.f32.xlu0 %v55_v25 }
  0x1b   :  { %197 = vmatpush.xpose.msrb.mxu0 %v116_v17  ;;  %119 = vmatpush.xpose.msra.mxu1 %v118_v26 }
  0x1e   :  { %121 = vmatmul.f32.vlgmr.msra.gmra.mxu1 %v85_v9 }
  0x1f   :  { %218 = vmatpush.xpose.msrb.mxu1 %v81_v7 }
  0x20   :  { %199 = vmatmul.f32.vlgmr.msrb.gmra.mxu0 %v85_v9 }
  0x23   :  { %220 = vmatpush.xpose.msrb.mxu1 %v83_v8 }
  0x26   :  { %222 = vmatmul.f32.vlgmr.msrb.gmra.mxu1 %v85_v9 }
  0x83   :  { %v54_v27 = vpop.xlane.xlu0 %53  ;;  %v49_v44 = vpop.xlane.xlu1 %48 }
  0x84   :  { %v230_v38 = vperm.slane %v54_v27, %v229_v30 }
  0x8c   :  { %v57_v34 = vpop.xlane.xlu0 %56 }
  0x8d   :  { %v232_v39 = vperm.slane %v57_v34, %v231_v31 }
  0x8f   :  { %v234_v43 = vsel %vm233_vm1, %v232_v39, %v230_v38 }
  0x90   :  { %v248_v47 = vadd.f32 %v234_v43, %v49_v44 }
  0x95   :  { %v91_v29 = vpop.f32.mrf.mxu0 }
  0x99   :  { %v173_v36 = vpop.f32.mrf.mxu3 }
  0x9b   :  { %v122_v32 = vpop.f32.mrf.mxu1  ;;  %v148_v33 = vpop.f32.mrf.mxu2 }
  0x9c   :  { %v123_v35 = vadd.f32 %v122_v32, %v91_v29 }
  0x9d   :  { %v200_v40 = vpop.f32.mrf.mxu0 }
  0x9e   :  { %v149_v37 = vadd.f32 %v148_v33, %v123_v35 }
  0xa0   :  { %v174_v41 = vadd.f32 %v173_v36, %v149_v37 }
  0xa2   :  { %v201_v42 = vadd.f32 %v200_v40, %v174_v41 }
  0xa3   :  { %v223_v45 = vpop.f32.mrf.mxu1 }
  0xa4   :  { %v224_v46 = vadd.f32 %v223_v45, %v201_v42 }
  0xa6   :  { %v249_v48 = vmul.f32 2.0, %v224_v46 }
  0xa8   :  { %v250_v49 = vsub.f32 %v248_v47, %v249_v48 }
  0xaa   :  { %v251_v50 = vmax.f32 %v250_v49, 0.0 }
  0xac   :  { %v252_v51 = vsub.f32 0.0, %v251_v50 }
  0xae   :  { %v769_v52 = vmul.f32 20.0, %v252_v51 }
  0xaf LB: > { %vm267_vm2 = vcmask 130048   ;;  %s469_s1 = sadd.s32 1, %s725_s0   ;;  %s725_s0 = sphi %s775_s0, %s832_s0   ;;  %v721_v54 = vphi %v773_v54, %v831_v54   ;;  %v717_v53 = vphi %v771_v53, %v830_v53  }
  0xb0   : > { %v265_v55 = vadd.f32 %v717_v53, %v769_v52  ;;  %p259_p0 = scmp.lt.s32.totalorder %s469_s1, 20  ;;  %s832_s0 = smov %s469_s1 }
  0xb2   : > { %v266_v56 = vadd.f32 %v721_v54, %v265_v55 }
  0xb4   : > { %v268_v57 = vsel %vm267_vm2, %v266_v56, -inf }
  0xb5   : > { %269 = vmax.xlane.f32.xlu0 %v268_v57 }
 0x128   : > { %v270_v58 = vpop.xlane.xlu0 %269 }
 0x129   : > { %v271_v59 = vsub.f32 %v266_v56, %v270_v58 }
 0x12b   : > { %v272_v60 = vmul.f32 1.442695, %v271_v59 }
 0x12d   : > { %581 = vpow2.f32 %v272_v60 }
 0x133   : > { %v582_v61 = vpop.eup %581 }
 0x134   : > { %v274_v62 = vsel %vm267_vm2, %v582_v61, 0.0 }
 0x135   : > { %275 = vadd.xlane.f32.xlu0 %v274_v62 }
 0x1a8   : > { %v276_v63 = vpop.xlane.xlu0 %275 }
 0x1a9   : > { %583 = vlog2.f32 %v276_v63 }
 0x1af   : > { %v584_v2 = vpop.eup %583 }
 0x1b0   : > { %v278_v3 = vmul.f32 0.6931472, %v584_v2 }
 0x1b2   : > { %v279_v4 = vadd.f32 %v278_v3, %v270_v58 }
 0x1b4   : > { %v280_v5 = vsub.f32 -2.0794415, %v279_v4 }
 0x1b6   : > { %v281_v6 = vadd.f32 %v721_v54, %v280_v5 }
 0x1b8   : > { %v282_v7 = vadd.f32 %v281_v6, %v265_v55 }
 0x1ba   : > { %v283_v8 = vsel %vm267_vm2, %v282_v7, -inf }
 0x1bb   : > { %v284_v9 = vrot.slane %v283_v8, 4 }
 0x1bd   : > { %v285_v10 = vmax.f32 %v283_v8, %v284_v9 }
 0x1bf   : > { %v286_v11 = vrot.slane %v285_v10, 2 }
 0x1c1   : > { %v287_v12 = vmax.f32 %v285_v10, %v286_v11 }
 0x1c3   : > { %v288_v13 = vrot.slane %v287_v12, 1 }
 0x1c5   : > { %v289_v14 = vmax.f32 %v287_v12, %v288_v13 }
 0x1c7   : > { %v290_v15 = vsub.f32 %v282_v7, %v289_v14 }
 0x1c9   : > { %v291_v16 = vmul.f32 1.442695, %v290_v15 }
 0x1cb   : > { %585 = vpow2.f32 %v291_v16 }
 0x1d1   : > { %v586_v17 = vpop.eup %585 }
 0x1d2   : > { %v293_v18 = vsel %vm267_vm2, %v586_v17, 0.0 }
 0x1d3   : > { %v294_v19 = vrot.slane %v293_v18, 4 }
 0x1d5   : > { %v295_v20 = vadd.f32 %v294_v19, %v293_v18 }
 0x1d7   : > { %v296_v21 = vrot.slane %v295_v20, 2 }
 0x1d9   : > { %v297_v22 = vadd.f32 %v296_v21, %v295_v20 }
 0x1db   : > { %v298_v23 = vrot.slane %v297_v22, 1 }
 0x1dd   : > { %v299_v24 = vadd.f32 %v298_v23, %v297_v22 }
 0x1df   : > { %587 = vlog2.f32 %v299_v24 }
 0x1e5   : > { %v588_v25 = vpop.eup %587 }
 0x1e6   : > { %v301_v26 = vmul.f32 0.6931472, %v588_v25 }
 0x1e8   : > { %v302_v27 = vadd.f32 %v301_v26, %v289_v14 }
 0x1ea   : > { %v303_v28 = vsub.f32 -2.7725885, %v302_v27 }
 0x1ec   : > { %v304_v29 = vadd.f32 %v717_v53, %v303_v28 }
 0x1ee   : > { %v305_v30 = vadd.f32 %v304_v29, %v769_v52 }
 0x1f0   : > { %v306_v31 = vadd.f32 %v305_v30, %v281_v6 }
 0x1f2   : > { %v307_v32 = vsel %vm267_vm2, %v306_v31, -inf }
 0x1f3   : > { %308 = vmax.xlane.f32.xlu1 %v307_v32 }
 0x266   : > { %v309_v33 = vpop.xlane.xlu1 %308 }
 0x267   : > { %v310_v34 = vsub.f32 %v306_v31, %v309_v33 }
 0x269   : > { %v311_v35 = vmul.f32 1.442695, %v310_v34 }
 0x26b   : > { %589 = vpow2.f32 %v311_v35 }
 0x271   : > { %v590_v36 = vpop.eup %589 }
 0x272   : > { %v313_v37 = vsel %vm267_vm2, %v590_v36, 0.0 }
 0x273   : > { %314 = vadd.xlane.f32.xlu1 %v313_v37 }
 0x2e6   : > { %v315_v38 = vpop.xlane.xlu1 %314 }
 0x2e7   : > { %591 = vlog2.f32 %v315_v38 }
 0x2ed   : > { %v592_v39 = vpop.eup %591 }
 0x2ee   : > { %v317_v40 = vmul.f32 0.6931472, %v592_v39 }
 0x2f0   : > { %v318_v41 = vadd.f32 %v317_v40, %v309_v33 }
 0x2f2   : > { %v319_v42 = vsub.f32 -2.0794415, %v318_v41 }
 0x2f4   : > { %v320_v43 = vadd.f32 %v319_v42, %v281_v6 }
 0x2f6   : > { %v321_v44 = vadd.f32 %v320_v43, %v305_v30 }
 0x2f8   : > { %v322_v45 = vsel %vm267_vm2, %v321_v44, -inf }
 0x2f9   : > { %v323_v46 = vrot.slane %v322_v45, 4 }
 0x2fb   : > { %v324_v47 = vmax.f32 %v322_v45, %v323_v46 }
 0x2fd   : > { %v325_v48 = vrot.slane %v324_v47, 2 }
 0x2ff   : > { %v326_v49 = vmax.f32 %v324_v47, %v325_v48 }
 0x301   : > { %v327_v50 = vrot.slane %v326_v49, 1 }
 0x303   : > { %v328_v51 = vmax.f32 %v326_v49, %v327_v50 }
 0x305   : > { %v329_v53 = vsub.f32 %v321_v44, %v328_v51 }
 0x307   : > { %v330_v54 = vmul.f32 1.442695, %v329_v53 }
 0x309   : > { %593 = vpow2.f32 %v330_v54 }
 0x30f   : > { %v594_v55 = vpop.eup %593 }
 0x310   : > { %v332_v56 = vsel %vm267_vm2, %v594_v55, 0.0 }
 0x311   : > { %v333_v57 = vrot.slane %v332_v56, 4 }
 0x313   : > { %v334_v58 = vadd.f32 %v333_v57, %v332_v56 }
 0x315   : > { %v335_v59 = vrot.slane %v334_v58, 2 }
 0x317   : > { %v336_v60 = vadd.f32 %v335_v59, %v334_v58 }
 0x319   : > { %v337_v61 = vrot.slane %v336_v60, 1 }
 0x31b   : > { %v338_v62 = vadd.f32 %v337_v61, %v336_v60 }
 0x31d   : > { %595 = vlog2.f32 %v338_v62 }
 0x323   : > { %v596_v63 = vpop.eup %595 }
 0x324   : > { %v340_v2 = vmul.f32 0.6931472, %v596_v63 }
 0x326   : > { %v341_v3 = vadd.f32 %v340_v2, %v328_v51 }
 0x328   : > { %v342_v4 = vsub.f32 -2.7725885, %v341_v3 }
 0x32a   : > { %v343_v5 = vadd.f32 %v342_v4, %v304_v29 }
 0x32c   : > { %v344_v6 = vadd.f32 %v343_v5, %v769_v52 }
 0x32e   : > { %v345_v7 = vadd.f32 %v344_v6, %v320_v43 }
 0x330   : > { %v346_v8 = vsel %vm267_vm2, %v345_v7, -inf }
 0x331   : > { %347 = vmax.xlane.f32.xlu2 %v346_v8 }
 0x3a4   : > { %v348_v9 = vpop.xlane.xlu2 %347 }
 0x3a5   : > { %v349_v10 = vsub.f32 %v345_v7, %v348_v9 }
 0x3a7   : > { %v350_v11 = vmul.f32 1.442695, %v349_v10 }
 0x3a9   : > { %597 = vpow2.f32 %v350_v11 }
 0x3af   : > { %v598_v12 = vpop.eup %597 }
 0x3b0   : > { %v352_v13 = vsel %vm267_vm2, %v598_v12, 0.0 }
 0x3b1   : > { %353 = vadd.xlane.f32.xlu2 %v352_v13 }
 0x424   : > { %v354_v14 = vpop.xlane.xlu2 %353 }
 0x425   : > { %599 = vlog2.f32 %v354_v14 }
 0x42b   : > { %v600_v15 = vpop.eup %599 }
 0x42c   : > { %v356_v16 = vmul.f32 0.6931472, %v600_v15 }
 0x42e   : > { %v357_v17 = vadd.f32 %v356_v16, %v348_v9 }
 0x430   : > { %v358_v18 = vsub.f32 -2.0794415, %v357_v17 }
 0x432   : > { %v359_v19 = vadd.f32 %v358_v18, %v320_v43 }
 0x434   : > { %v360_v20 = vadd.f32 %v359_v19, %v344_v6 }
 0x436   : > { %v361_v21 = vsel %vm267_vm2, %v360_v20, -inf }
 0x437   : > { %v362_v22 = vrot.slane %v361_v21, 4 }
 0x439   : > { %v363_v23 = vmax.f32 %v361_v21, %v362_v22 }
 0x43b   : > { %v364_v24 = vrot.slane %v363_v23, 2 }
 0x43d   : > { %v365_v25 = vmax.f32 %v363_v23, %v364_v24 }
 0x43f   : > { %v366_v26 = vrot.slane %v365_v25, 1 }
 0x441   : > { %v367_v27 = vmax.f32 %v365_v25, %v366_v26 }
 0x443   : > { %v368_v28 = vsub.f32 %v360_v20, %v367_v27 }
 0x445   : > { %v369_v29 = vmul.f32 1.442695, %v368_v28 }
 0x447   : > { %601 = vpow2.f32 %v369_v29 }
 0x44d   : > { %v602_v30 = vpop.eup %601 }
 0x44e   : > { %v371_v31 = vsel %vm267_vm2, %v602_v30, 0.0 }
 0x44f   : > { %v372_v32 = vrot.slane %v371_v31, 4 }
 0x451   : > { %v373_v33 = vadd.f32 %v372_v32, %v371_v31 }
 0x453   : > { %v374_v34 = vrot.slane %v373_v33, 2 }
 0x455   : > { %v375_v35 = vadd.f32 %v374_v34, %v373_v33 }
 0x457   : > { %v376_v36 = vrot.slane %v375_v35, 1 }
 0x459   : > { %v377_v37 = vadd.f32 %v376_v36, %v375_v35 }
 0x45b   : > { %603 = vlog2.f32 %v377_v37 }
 0x461   : > { %v604_v38 = vpop.eup %603 }
 0x462   : > { %v379_v39 = vmul.f32 0.6931472, %v604_v38 }
 0x464   : > { %v380_v40 = vadd.f32 %v379_v39, %v367_v27 }
 0x466   : > { %v381_v41 = vsub.f32 -2.7725885, %v380_v40 }
 0x468   : > { %v382_v42 = vadd.f32 %v381_v41, %v343_v5 }
 0x46a   : > { %v383_v43 = vadd.f32 %v382_v42, %v769_v52 }
 0x46c   : > { %v384_v44 = vadd.f32 %v383_v43, %v359_v19 }
 0x46e   : > { %v385_v45 = vsel %vm267_vm2, %v384_v44, -inf }
 0x46f   : > { %386 = vmax.xlane.f32.xlu0 %v385_v45 }
 0x4e2   : > { %v387_v46 = vpop.xlane.xlu0 %386 }
 0x4e3   : > { %v388_v47 = vsub.f32 %v384_v44, %v387_v46 }
 0x4e5   : > { %v389_v48 = vmul.f32 1.442695, %v388_v47 }
 0x4e7   : > { %605 = vpow2.f32 %v389_v48 }
 0x4ed   : > { %v606_v49 = vpop.eup %605 }
 0x4ee   : > { %v391_v50 = vsel %vm267_vm2, %v606_v49, 0.0 }
 0x4ef   : > { %392 = vadd.xlane.f32.xlu1 %v391_v50 }
 0x562   : > { %v393_v51 = vpop.xlane.xlu1 %392 }
 0x563   : > { %607 = vlog2.f32 %v393_v51 }
 0x569   : > { %v608_v53 = vpop.eup %607 }
 0x56a   : > { %v395_v54 = vmul.f32 0.6931472, %v608_v53 }
 0x56c   : > { %v396_v55 = vadd.f32 %v395_v54, %v387_v46 }
 0x56e   : > { %v397_v56 = vsub.f32 -2.0794415, %v396_v55 }
 0x570   : > { %v398_v57 = vadd.f32 %v397_v56, %v359_v19 }
 0x572   : > { %v399_v58 = vadd.f32 %v398_v57, %v383_v43 }
 0x574   : > { %v400_v59 = vsel %vm267_vm2, %v399_v58, -inf }
 0x575   : > { %v401_v60 = vrot.slane %v400_v59, 4 }
 0x577   : > { %v402_v61 = vmax.f32 %v400_v59, %v401_v60 }
 0x579   : > { %v403_v62 = vrot.slane %v402_v61, 2 }
 0x57b   : > { %v404_v63 = vmax.f32 %v402_v61, %v403_v62 }
 0x57d   : > { %v405_v2 = vrot.slane %v404_v63, 1 }
 0x57f   : > { %v406_v3 = vmax.f32 %v404_v63, %v405_v2 }
 0x581   : > { %v407_v4 = vsub.f32 %v399_v58, %v406_v3 }
 0x583   : > { %v408_v5 = vmul.f32 1.442695, %v407_v4 }
 0x585   : > { %609 = vpow2.f32 %v408_v5 }
 0x58b   : > { %v610_v6 = vpop.eup %609 }
 0x58c   : > { %v410_v7 = vsel %vm267_vm2, %v610_v6, 0.0 }
 0x58d   : > { %v411_v8 = vrot.slane %v410_v7, 4 }
 0x58f   : > { %v412_v9 = vadd.f32 %v411_v8, %v410_v7 }
 0x591   : > { %v413_v10 = vrot.slane %v412_v9, 2 }
 0x593   : > { %v414_v11 = vadd.f32 %v413_v10, %v412_v9 }
 0x595   : > { %v415_v12 = vrot.slane %v414_v11, 1 }
 0x597   : > { %v416_v13 = vadd.f32 %v415_v12, %v414_v11 }
 0x599   : > { %611 = vlog2.f32 %v416_v13 }
 0x59f   : > { %v612_v14 = vpop.eup %611 }
 0x5a0   : > { %v418_v15 = vmul.f32 0.6931472, %v612_v14 }
 0x5a2   : > { %v419_v16 = vadd.f32 %v418_v15, %v406_v3 }
 0x5a4   : > { %v420_v17 = vsub.f32 -2.7725885, %v419_v16 }
 0x5a6   : > { %v421_v18 = vadd.f32 %v420_v17, %v382_v42 }
 0x5a8   : > { %v422_v19 = vadd.f32 %v421_v18, %v769_v52 }
 0x5aa   : > { %v423_v20 = vadd.f32 %v422_v19, %v398_v57 }
 0x5ac   : > { %v424_v21 = vsel %vm267_vm2, %v423_v20, -inf }
 0x5ad   : > { %425 = vmax.xlane.f32.xlu2 %v424_v21 }
 0x620   : > { %v426_v22 = vpop.xlane.xlu2 %425 }
 0x621   : > { %v427_v23 = vsub.f32 %v423_v20, %v426_v22 }
 0x623   : > { %v428_v24 = vmul.f32 1.442695, %v427_v23 }
 0x625   : > { %613 = vpow2.f32 %v428_v24 }
 0x62b   : > { %v614_v25 = vpop.eup %613 }
 0x62c   : > { %v430_v26 = vsel %vm267_vm2, %v614_v25, 0.0 }
 0x62d   : > { %431 = vadd.xlane.f32.xlu0 %v430_v26 }
 0x6a0   : > { %v432_v27 = vpop.xlane.xlu0 %431 }
 0x6a1   : > { %615 = vlog2.f32 %v432_v27 }
 0x6a7   : > { %v616_v28 = vpop.eup %615 }
 0x6a8   : > { %v434_v29 = vmul.f32 0.6931472, %v616_v28 }
 0x6aa   : > { %v435_v30 = vadd.f32 %v434_v29, %v426_v22 }
 0x6ac   : > { %v436_v31 = vsub.f32 -2.0794415, %v435_v30 }
 0x6ae   : > { %v437_v32 = vadd.f32 %v436_v31, %v398_v57   ;;  %v461_v33 = vand.u32 2147483647, %v436_v31 }
 0x6b0   : > { %v438_v34 = vadd.f32 %v437_v32, %v422_v19  ;;  %v462_v35 = vrot.slane %v461_v33, 4 }
 0x6b2   : > { %v439_v36 = vsel %vm267_vm2, %v438_v34, -inf  ;;  %v463_v37 = vadd.f32 %v462_v35, %v461_v33 }
 0x6b3   : > { %v440_v38 = vrot.slane %v439_v36, 4 }
 0x6b4   : > { %v464_v39 = vrot.slane %v463_v37, 2 }
 0x6b5   : > { %v441_v40 = vmax.f32 %v439_v36, %v440_v38 }
 0x6b6   : > { %v465_v41 = vadd.f32 %v464_v39, %v463_v37 }
 0x6b7   : > { %v442_v42 = vrot.slane %v441_v40, 2 }
 0x6b8   : > { %v466_v43 = vrot.slane %v465_v41, 1 }
 0x6b9   : > { %v443_v44 = vmax.f32 %v441_v40, %v442_v42 }
 0x6ba   : > { %v467_v45 = vadd.f32 %v466_v43, %v465_v41 }
 0x6bb   : > { %v444_v46 = vrot.slane %v443_v44, 1 }
 0x6bc   : > { %550 = vpush %v467_v45 }
 0x6bd   : > { %v445_v47 = vmax.f32 %v443_v44, %v444_v46 }
 0x6bf   : > { %v446_v48 = vsub.f32 %v438_v34, %v445_v47 }
 0x6c1   : > { %v447_v49 = vmul.f32 1.442695, %v446_v48 }
 0x6c3   : > { %617 = vpow2.f32 %v447_v49 }
 0x6c9   : > { %v618_v50 = vpop.eup %617 }
 0x6ca   : > { %v449_v51 = vsel %vm267_vm2, %v618_v50, 0.0 }
 0x6cb   : > { %v450_v53 = vrot.slane %v449_v51, 4 }
 0x6cd   : > { %v451_v54 = vadd.f32 %v450_v53, %v449_v51 }
 0x6cf   : > { %v452_v55 = vrot.slane %v451_v54, 2 }
 0x6d1   : > { %v453_v56 = vadd.f32 %v452_v55, %v451_v54  ;;  %v831_v54 = vmov %v437_v32 }
 0x6d3   : > { %v454_v57 = vrot.slane %v453_v56, 1 }
 0x6d5   : > { %v455_v58 = vadd.f32 %v454_v57, %v453_v56 }
 0x6d7   : > { %619 = vlog2.f32 %v455_v58 }
 0x6dd   : > { %v620_v59 = vpop.eup %619 }
 0x6de   : > { %v457_v60 = vmul.f32 0.6931472, %v620_v59 }
 0x6e0   : > { %v458_v61 = vadd.f32 %v457_v60, %v445_v47 }
 0x6e2   : > { %v459_v62 = vsub.f32 -2.7725885, %v458_v61 }
 0x6e4   : > { %v460_v63 = vadd.f32 %v459_v62, %v421_v18  }
 0x6e6   : > { %v830_v53 = vmov %v460_v63 }
 0x6ed   : > { %s551_s21 = spop %550 }
 0x6ee   : > { %p260_p1 = scmp.ge.f32.partialorder %s551_s21, 0.02 }
 0x6f0   : > { %p261_p2 = pnand %p260_p1, %p259_p0 }
 0x6f1   :  { %v470_v2 = vadd.f32 (%p261_p2), %v437_v32, %v769_v52  ;;  %510 = vmatpush.msrb.mxu2 (%p261_p2), %v753_v0  ;;  %s731_s22 = smov (%p261_p2), [#allocation7]   ;;  %s524_s26 = sshll.u32 (%p261_p2), %s829_s2, 4  ;;  %s525_s26 = int_to_ptr.hbm [resolvable:$true] %s524_s26 }
 0x6f2   :  { %264 = sbr.rel (!%p261_p2) target bundleno = 175 (0xaf), region = 43  ;;  %s522_s23 = sshll.u32 (%p261_p2), %s731_s22, 4  ;;  %s523_s23 = int_to_ptr.vmem [resolvable:$true] %s522_s23 }
 0x6f3   :  { %v471_v3 = vadd.f32 (%p261_p2), %v470_v2, %v460_v63  ;;  %511 = vmatpush.msrb.mxu2 (%p261_p2), %v755_v1 }
 0x6f5   :  { %v472_v4 = vmul.f32 (%p261_p2), 1.442695, %v471_v3 }
 0x6f7   :  { %621 = vpow2.f32 %v472_v4 }
 0x6fd   :  { %v622_v5 = vpop.eup %621 }
 0x6fe   :  { %v475_v6 = vsel %vm267_vm2, %v622_v5, 0.0 }
 0x6ff   :  { %476 = vadd.xlane.f32.xlu0 %v475_v6 }
 0x772   :  { %v477_v7 = vpop.xlane.xlu0 %476 }
 0x773   :  { %623 = vrcp.f32 %v477_v7  ;;  %v489_v11 = vand.u32 2147483648, %v477_v7  ;;  %v487_v52 = vand.u32 2147483647, %v477_v7  ;;  %vm483_vm4 = vweird.f32 %v477_v7 }
 0x775   :  { %v490_v13 = vor.u32 1.1754944e-38, %v489_v11  ;;  %vm488_vm6 = vcmp.eq.f32.partialorder %v487_v52, 8.507059e+37 }
 0x779   :  { %v624_v8 = vpop.eup %623 }
 0x77a   :  { %v479_v9 = vmul.f32 %v624_v8, %v477_v7  ;;  %vm484_vm3 = vweird.f32 %v624_v8 }
 0x77b   :  { %vm485_vm5 = vmor %vm483_vm4, %vm484_vm3 }
 0x77c   :  { %v480_v10 = vsub.f32 1.0, %v479_v9 }
 0x77e   :  { %v481_v12 = vmul.f32 %v624_v8, %v480_v10 }
 0x780   :  { %v482_v0 = vadd.f32 %v624_v8, %v481_v12 }
 0x782   :  { %v486_v1 = vsel %vm485_vm5, %v624_v8, %v482_v0 }
 0x783   :  { %v491_v14 = vsel %vm488_vm6, %v490_v13, %v486_v1 }
 0x784   :  { %v492_v15 = vmul.f32 %v622_v5, %v491_v14 }
 0x786   :  { %549 = vmatmul.msk.f32.vlgmr.msrb.gmra.mxu2 %vm267_vm2, %v492_v15 }
 0x809   :  { %v513_v16 = vpop.f32.mrf.mxu2 }
 0x80a   :  { %516 = vst.msk [vmem:[#allocation7] sm:$0xff] %vm46_vm0, %v513_v16 }
 0x80b   :  { %527 = dma.vmem_to_hbm [thread:$0]  %s523_s23, 128, %s525_s26, [#allocation4]  }
 0x80c   :  { %713 = dma.done.wait [#allocation4], 128  }
 0x80d   :  { %714 = vsyncadd [#allocation4], 4294967168 }
 0x80e   :  { %532 = vsyncpa [#allocation3], 1 }
 0x80f   :  { %533 = vsyncpa [#allocation6], 1 }
 0x810   :  { %534 = vsyncpa [#allocation4], 1 }

</bundles_post_ra>
